<compile_context>
chip_gen: v5e
topology: v5e:2x2
jax: 0.10.0
libtpu: 0.0.40
codegen_flags: <defaults>
</compile_context>

<pallas_src>
import jax
import jax.numpy as jnp
from jax.experimental import pallas as pl
from jax.experimental.pallas import tpu as pltpu

# ---- small, module-consistent sizes --------------------------------------
B = 2             # batch
S = 8             # sequence length
V = 50            # vocab size (synthetic)
E = 32            # embedding dim
H = 32            # encoder hidden dim (768 in the real BERT)
C = 9             # num_labels = 9 (WikiNER token classes)
CP = 128          # class dim padded to one full lane width (unmasked stores)
IGNORE_INDEX = -100
NEG_INF = -1e9    # bias value for padded class columns (kills them in softmax)


# ---------------------------------------------------------------------------
# Fused kernel: encoder projection + GELU, classifier head, token-level CE.
# ---------------------------------------------------------------------------
def wikiner_kernel(emb_ref, wenc_ref, benc_ref, wcls_ref, bcls_ref,
                   onehot_ref, logits_ref, loss_ref):
    # synthetic encoder hot path: (B*S, E) @ (E, H) on the MXU, f32 accumulate
    x = emb_ref[...]                                          # (B*S, E)
    h = jnp.dot(x, wenc_ref[...], preferred_element_type=jnp.float32)
    h = h + benc_ref[...]                                     # (1, H) broadcast
    h = jax.nn.gelu(h, approximate=True)                      # (B*S, H)

    # token-classification head: (B*S, H) @ (H, CP) + b   (CP = 128, lane-dense)
    z = jnp.dot(h, wcls_ref[...], preferred_element_type=jnp.float32)
    z = z + bcls_ref[...]                                     # (1, CP) broadcast
    logits_ref[...] = z                                       # (B*S, CP), unmasked vst

    # token-level cross entropy, mean over valid tokens
    # (matches nn.CrossEntropyLoss(ignore_index=-100) used by HF token cls).
    # Padded class columns carry logit ~ -1e9, so they vanish from the LSE.
    onehot = onehot_ref[...]                                  # (B*S, CP)
    valid = jnp.sum(onehot, axis=-1, keepdims=True)           # (B*S, 1): 1.0 = real label

    m = jnp.max(z, axis=-1, keepdims=True)                    # (B*S, 1)
    lse = m + jnp.log(jnp.sum(jnp.exp(z - m), axis=-1, keepdims=True))
    picked = jnp.sum(onehot * z, axis=-1, keepdims=True)      # (B*S, 1)
    per_tok = (lse - picked) * valid                          # masked CE per token

    num = jnp.sum(per_tok, keepdims=True)                     # (1, 1)
    den = jnp.maximum(jnp.sum(valid, keepdims=True), 1.0)     # (1, 1)
    loss_ref[...] = num / den


def wikiner_apply(emb_flat, w_enc, b_enc, w_cls_p, b_cls_p, onehot):
    vmem = pl.BlockSpec(memory_space=pltpu.MemorySpace.VMEM)
    return pl.pallas_call(
        wikiner_kernel,
        in_specs=[vmem] * 6,
        out_specs=(vmem, vmem),
        out_shape=(
            jax.ShapeDtypeStruct((B * S, CP), jnp.float32),   # padded per-token logits
            jax.ShapeDtypeStruct((1, 1), jnp.float32),        # scalar loss
        ),
    )(emb_flat, w_enc, b_enc, w_cls_p, b_cls_p, onehot)


# ---------------------------------------------------------------------------
# WikiNERBERT.forward wrapper: returns (logits, loss)
# ---------------------------------------------------------------------------
@jax.jit
def wikiner_forward(params, tokens, labels):
    emb_table, w_enc, b_enc, w_cls, b_cls = params
    bb, ss = tokens.shape

    # glue: embedding lookup (gather) + label preprocessing, done once in XLA
    tok_flat = tokens.reshape(-1)
    lab_flat = labels.reshape(-1)
    emb_flat = jnp.take(emb_table, tok_flat, axis=0).astype(jnp.float32)  # (B*S, E)

    valid = lab_flat != IGNORE_INDEX
    safe_labels = jnp.where(valid, lab_flat, 0)
    valid_f = valid.astype(jnp.float32)[:, None]                          # (B*S, 1)
    # one-hot over the padded class width; invalid tokens get an all-zero row
    onehot = jax.nn.one_hot(safe_labels, CP, dtype=jnp.float32) * valid_f

    # pad classifier weight/bias to 128 lanes: zero weight columns, -1e9 bias
    # keeps padded classes out of both argmax and the softmax denominator
    w_cls_p = jnp.zeros((H, CP), jnp.float32).at[:, :C].set(w_cls)
    b_cls_p = jnp.full((1, CP), NEG_INF, jnp.float32).at[:, :C].set(b_cls)

    logits_p, loss = wikiner_apply(emb_flat, w_enc, b_enc,
                                   w_cls_p, b_cls_p, onehot)
    logits = logits_p[:, :C].reshape(bb, ss, C)
    return logits, loss[0, 0]


# ---------------------------------------------------------------------------
if __name__ == "__main__":
    key = jax.random.PRNGKey(0)
    k_tok, k_lab, kp1, kp2, kp3 = jax.random.split(key, 5)

    # inputs: token ids and per-token labels ([CLS]-style position ignored)
    tokens = jax.random.randint(k_tok, (B, S), 0, V, dtype=jnp.int32)
    labels = jax.random.randint(k_lab, (B, S), 0, C, dtype=jnp.int32)
    labels = labels.at[:, 0].set(IGNORE_INDEX)        # exercise ignore_index=-100

    # deterministic parameter init (synthetic encoder + classifier head)
    emb_table = 0.02 * jax.random.normal(kp1, (V, E), jnp.float32)
    w_enc = 0.02 * jax.random.normal(kp2, (E, H), jnp.float32)
    b_enc = jnp.zeros((1, H), jnp.float32)
    w_cls = 0.02 * jax.random.normal(kp3, (H, C), jnp.float32)
    b_cls = jnp.zeros((1, C), jnp.float32)
    params = (emb_table, w_enc, b_enc, w_cls, b_cls)

    logits, loss = wikiner_forward(params, tokens, labels)
    jax.block_until_ready((logits, loss))

    assert logits.shape == (B, S, C), logits.shape
    assert bool(jnp.isfinite(loss)), loss
    print("KERNEL_OK")
</pallas_src>

<mosaic_0001>
module attributes {stable_mosaic.version = 11 : i64} {
  func.func @wikiner_kernel(%arg0: memref<16x32xf32, #tpu.memory_space<vmem>>, %arg1: memref<32x32xf32, #tpu.memory_space<vmem>>, %arg2: memref<1x32xf32, #tpu.memory_space<vmem>>, %arg3: memref<32x128xf32, #tpu.memory_space<vmem>>, %arg4: memref<1x128xf32, #tpu.memory_space<vmem>>, %arg5: memref<16x128xf32, #tpu.memory_space<vmem>>, %arg6: memref<16x128xf32, #tpu.memory_space<vmem>>, %arg7: memref<1x1xf32, #tpu.memory_space<vmem>>) attributes {dimension_semantics = [], scalar_prefetch = 0 : i64, scratch_operands = 0 : i64, tpu.core_type = #tpu.core_type<tc>} {
    %c0 = arith.constant 0 : index
    %c0_0 = arith.constant 0 : index
    %0 = vector.load %arg0[%c0, %c0_0] : memref<16x32xf32, #tpu.memory_space<vmem>>, vector<16x32xf32>
    %c0_1 = arith.constant 0 : index
    %c0_2 = arith.constant 0 : index
    %1 = vector.load %arg1[%c0_1, %c0_2] : memref<32x32xf32, #tpu.memory_space<vmem>>, vector<32x32xf32>
    %cst = arith.constant dense<0.000000e+00> : vector<16x32xf32>
    %2 = tpu.matmul %0, %1, %cst {dimension_numbers = #tpu.dot_dimension_numbers<[1], [0], [0], [1], [0, 0, 1, 1], [], []>} : vector<16x32xf32>, vector<32x32xf32>, vector<16x32xf32> -> vector<16x32xf32>
    %c0_3 = arith.constant 0 : index
    %c0_4 = arith.constant 0 : index
    %3 = vector.load %arg2[%c0_3, %c0_4] : memref<1x32xf32, #tpu.memory_space<vmem>>, vector<1x32xf32>
    %4 = vector.broadcast %3 : vector<1x32xf32> to vector<16x32xf32>
    %5 = arith.addf %2, %4 : vector<16x32xf32>
    %6 = arith.mulf %5, %5 : vector<16x32xf32>
    %7 = arith.mulf %5, %6 : vector<16x32xf32>
    %cst_5 = arith.constant 4.471500e-02 : f32
    %8 = vector.broadcast %cst_5 : f32 to vector<16x32xf32>
    %9 = arith.mulf %8, %7 : vector<16x32xf32>
    %10 = arith.addf %5, %9 : vector<16x32xf32>
    %cst_6 = arith.constant 0.797884583 : f32
    %11 = vector.broadcast %cst_6 : f32 to vector<16x32xf32>
    %12 = arith.mulf %11, %10 : vector<16x32xf32>
    %13 = math.tanh %12 : vector<16x32xf32>
    %cst_7 = arith.constant 1.000000e+00 : f32
    %14 = vector.broadcast %cst_7 : f32 to vector<16x32xf32>
    %15 = arith.addf %14, %13 : vector<16x32xf32>
    %cst_8 = arith.constant 5.000000e-01 : f32
    %16 = vector.broadcast %cst_8 : f32 to vector<16x32xf32>
    %17 = arith.mulf %16, %15 : vector<16x32xf32>
    %18 = arith.mulf %5, %17 : vector<16x32xf32>
    %c0_9 = arith.constant 0 : index
    %c0_10 = arith.constant 0 : index
    %19 = vector.load %arg3[%c0_9, %c0_10] : memref<32x128xf32, #tpu.memory_space<vmem>>, vector<32x128xf32>
    %cst_11 = arith.constant dense<0.000000e+00> : vector<16x128xf32>
    %20 = tpu.matmul %18, %19, %cst_11 {dimension_numbers = #tpu.dot_dimension_numbers<[1], [0], [0], [1], [0, 0, 1, 1], [], []>} : vector<16x32xf32>, vector<32x128xf32>, vector<16x128xf32> -> vector<16x128xf32>
    %c0_12 = arith.constant 0 : index
    %c0_13 = arith.constant 0 : index
    %21 = vector.load %arg4[%c0_12, %c0_13] : memref<1x128xf32, #tpu.memory_space<vmem>>, vector<1x128xf32>
    %22 = vector.broadcast %21 : vector<1x128xf32> to vector<16x128xf32>
    %23 = arith.addf %20, %22 : vector<16x128xf32>
    %c0_14 = arith.constant 0 : index
    %c0_15 = arith.constant 0 : index
    %24 = vector.load %arg6[%c0_14, %c0_15] : memref<16x128xf32, #tpu.memory_space<vmem>>, vector<16x128xf32>
    tpu.vector_store %arg6[%c0_14, %c0_15], %23 {strides = array<i32>} : memref<16x128xf32, #tpu.memory_space<vmem>>, vector<16x128xf32>,
    %c0_16 = arith.constant 0 : index
    %c0_17 = arith.constant 0 : index
    %25 = vector.load %arg5[%c0_16, %c0_17] : memref<16x128xf32, #tpu.memory_space<vmem>>, vector<16x128xf32>
    %cst_18 = arith.constant dense<0.000000e+00> : vector<16xf32>
    %26 = vector.multi_reduction <add>, %25, %cst_18 [1] : vector<16x128xf32> to vector<16xf32>
    %27 = vector.shape_cast %26 : vector<16xf32> to vector<16x1xf32>
    %cst_19 = arith.constant dense<0xFF800000> : vector<16xf32>
    %28 = vector.multi_reduction <maximumf>, %23, %cst_19 [1] : vector<16x128xf32> to vector<16xf32>
    %29 = vector.shape_cast %28 : vector<16xf32> to vector<16x1xf32>
    %30 = vector.broadcast %29 : vector<16x1xf32> to vector<16x128xf32>
    %31 = arith.subf %23, %30 : vector<16x128xf32>
    %32 = math.exp %31 : vector<16x128xf32>
    %cst_20 = arith.constant dense<0.000000e+00> : vector<16xf32>
    %33 = vector.multi_reduction <add>, %32, %cst_20 [1] : vector<16x128xf32> to vector<16xf32>
    %34 = vector.shape_cast %33 : vector<16xf32> to vector<16x1xf32>
    %35 = math.log %34 : vector<16x1xf32>
    %36 = arith.addf %29, %35 : vector<16x1xf32>
    %37 = arith.mulf %25, %23 : vector<16x128xf32>
    %cst_21 = arith.constant dense<0.000000e+00> : vector<16xf32>
    %38 = vector.multi_reduction <add>, %37, %cst_21 [1] : vector<16x128xf32> to vector<16xf32>
    %39 = vector.shape_cast %38 : vector<16xf32> to vector<16x1xf32>
    %40 = arith.subf %36, %39 : vector<16x1xf32>
    %41 = arith.mulf %40, %27 : vector<16x1xf32>
    %42 = vector.shape_cast %41 : vector<16x1xf32> to vector<1x16x1xf32>
    %cst_22 = arith.constant dense<0.000000e+00> : vector<1xf32>
    %43 = vector.multi_reduction <add>, %42, %cst_22 [1, 2] : vector<1x16x1xf32> to vector<1xf32>
    %44 = vector.shape_cast %43 : vector<1xf32> to vector<1x1x1xf32>
    %45 = vector.extract %44[0, 0, 0] : f32 from vector<1x1x1xf32>
    %46 = vector.broadcast %45 : f32 to vector<1x1xf32>
    %47 = vector.shape_cast %27 : vector<16x1xf32> to vector<1x16x1xf32>
    %cst_23 = arith.constant dense<0.000000e+00> : vector<1xf32>
    %48 = vector.multi_reduction <add>, %47, %cst_23 [1, 2] : vector<1x16x1xf32> to vector<1xf32>
    %49 = vector.shape_cast %48 : vector<1xf32> to vector<1x1x1xf32>
    %50 = vector.extract %49[0, 0, 0] : f32 from vector<1x1x1xf32>
    %51 = vector.broadcast %50 : f32 to vector<1x1xf32>
    %cst_24 = arith.constant 1.000000e+00 : f32
    %52 = vector.broadcast %cst_24 : f32 to vector<1x1xf32>
    %53 = arith.maximumf %51, %52 : vector<1x1xf32>
    %54 = arith.divf %46, %53 : vector<1x1xf32>
    %c0_25 = arith.constant 0 : index
    %c0_26 = arith.constant 0 : index
    %55 = vector.load %arg7[%c0_25, %c0_26] : memref<1x1xf32, #tpu.memory_space<vmem>>, vector<1x1xf32>
    tpu.vector_store %arg7[%c0_25, %c0_26], %54 {strides = array<i32>} : memref<1x1xf32, #tpu.memory_space<vmem>>, vector<1x1xf32>,
    return
  }
}

</mosaic_0001>

<bundles_post_ra>
// kernel: wikiner_forward.1
= control target key start
LH: loop header
LB: loop body
LE: loop exit
PB: predicated region body
PF: predicated region fallthrough
CT: control target
= control target key end

     0   :  { %s383_s0 = inlined_call_operand.vmem [shape: f32[16,32], index: 0, kind: input, shape index: {}]   ;;  %s384_s1 = inlined_call_operand.vmem [shape: f32[32,32], index: 1, kind: input, shape index: {}]   ;;  %s385_s2 = inlined_call_operand.vmem [shape: f32[1,32], index: 2, kind: input, shape index: {}]   ;;  %s386_s3 = inlined_call_operand.vmem [shape: f32[32,128], index: 3, kind: input, shape index: {}]   ;;  %s387_s4 = inlined_call_operand.vmem [shape: f32[1,128], index: 4, kind: input, shape index: {}]   ;;  %s388_s5 = inlined_call_operand.vmem [shape: f32[16,128], index: 5, kind: input, shape index: {}]   ;;  %s389_s6 = inlined_call_operand.vmem [shape: f32[16,128], index: 6, kind: output, shape index: {0}]   ;;  %s390_s7 = inlined_call_operand.hbm [shape: f32[1,1], index: 7, kind: output, shape index: {1}]  }
   0x1   :  { %v31_v0 = vld [vmem:[%s384_s1 + $0x18] sm:$0xff]  ;;  %v30_v1 = vld [vmem:[%s384_s1 + $0x10] sm:$0xff]  ;;  %v29_v2 = vld [vmem:[%s384_s1 + $0x8] sm:$0xff] }
   0x2   :  { %55 = vmatpush.msra.mxu0 %v31_v0  ;;  %228 = vmatpush.msra.mxu2 %v31_v0 }
   0x4   :  { %56 = vmatpush.msra.mxu0 %v30_v1  ;;  %229 = vmatpush.msra.mxu2 %v30_v1 }
   0x5   :  { %13 = vsyncpa [#allocation3], 0  ;;  %v28_v3 = vld [vmem:[%s384_s1] sm:$0xff]  ;;  %vm36_vm0 = vcmask 261120   ;;  %v27_v5 = vld [vmem:[%s383_s0 + $0x8] sm:$0xff]  ;;  %vm159_vm1 = vcmask 7168  }
   0x6   :  { %57 = vmatpush.msra.mxu0 %v29_v2  ;;  %230 = vmatpush.msra.mxu2 %v29_v2  ;;  %v26_v4 = vld [vmem:[%s383_s0] sm:$0xff]  ;;  %v87_v6 = vld [vmem:[%s386_s3 + $0x18] sm:$0xff]  ;;  %v86_v7 = vld [vmem:[%s386_s3 + $0x10] sm:$0xff]  ;;  %s283_s28 = smov [#allocation2]   ;;  %s213_s9 = sshll.u32 %s390_s7, 4  ;;  %vm202_vm6 = vcmask 0   ;;  %s214_s9 = int_to_ptr.hbm [resolvable:$true] %s213_s9 }
   0x7   :  { %110 = vmatpush.msra.mxu1 %v87_v6  ;;  %232 = vmatpush.msra.mxu3 %v87_v6  ;;  %v85_v8 = vld [vmem:[%s386_s3 + $0x8] sm:$0xff]  ;;  %v84_v9 = vld [vmem:[%s386_s3] sm:$0xff]  ;;  %s211_s29 = sshll.u32 %s283_s28, 4  ;;  %s212_s29 = int_to_ptr.vmem [resolvable:$true] %s211_s29 }
   0x8   :  { %58 = vmatpush.msra.mxu0 %v28_v3  ;;  %231 = vmatpush.msra.mxu2 %v28_v3  ;;  %v241_v10 = vld [vmem:[%s385_s2] ss:$0 sm:$0xff]  ;;  %v124_v39 = vld [vmem:[%s388_s5 + $0x8] sm:$0xff] }
   0x9   :  { %224 = vmatmul.msk.f32.vlgmr.msra.gmra.mxu0 %vm36_vm0, %v26_v4  ;;  %225 = vmatmul.msk.f32.vlgmr.msra.gmra.mxu2 %vm36_vm0, %v27_v5  ;;  %v242_v33 = vld [vmem:[%s387_s4] ss:$0 sm:$0xff] }
   0xa   :  { %111 = vmatpush.msra.mxu1 %v86_v7  ;;  %233 = vmatpush.msra.mxu3 %v86_v7  ;;  %v123_v35 = vld [vmem:[%s388_s5] sm:$0xff] }
   0xc   :  { %112 = vmatpush.msra.mxu1 %v85_v8  ;;  %234 = vmatpush.msra.mxu3 %v85_v8 }
   0xe   :  { %113 = vmatpush.msra.mxu1 %v84_v9  ;;  %235 = vmatpush.msra.mxu3 %v84_v9 }
  0x86   :  { %v60_v11 = vpop.f32.mrf.mxu0 }
  0x87   :  { %v61_v12 = vadd.f32 %v241_v10, %v60_v11 }
  0x89   :  { %v66_v13 = vmul.f32 %v61_v12, %v61_v12 }
  0x8b   :  { %v68_v14 = vmul.f32 %v66_v13, %v61_v12 }
  0x8c   :  { %v63_v15 = vpop.f32.mrf.mxu2 }
  0x8d   :  { %v70_v16 = vmul.f32 0.044715, %v68_v14  ;;  %v64_v17 = vadd.f32 %v241_v10, %v63_v15 }
  0x8f   :  { %v72_v18 = vadd.f32 %v70_v16, %v61_v12  ;;  %v67_v19 = vmul.f32 %v64_v17, %v64_v17 }
  0x91   :  { %v69_v20 = vmul.f32 %v67_v19, %v64_v17  ;;  %v74_v21 = vmul.f32 0.7978846, %v72_v18 }
  0x93   :  { %v71_v22 = vmul.f32 0.044715, %v69_v20  ;;  %243 = vtanh.f32 %v74_v21 }
  0x95   :  { %v73_v23 = vadd.f32 %v71_v22, %v64_v17 }
  0x97   :  { %v75_v24 = vmul.f32 0.7978846, %v73_v23 }
  0x99   :  { %v244_v25 = vpop.eup %243  ;;  %245 = vtanh.f32 %v75_v24 }
  0x9a   :  { %v78_v26 = vadd.f32 1.0, %v244_v25 }
  0x9c   :  { %v80_v27 = vmul.f32 0.5, %v78_v26 }
  0x9e   :  { %v82_v28 = vmul.f32 %v80_v27, %v61_v12 }
  0x9f   :  { %v246_v29 = vpop.eup %245 }
  0xa0   :  { %226 = vmatmul.msk.f32.vlgmr.msra.gmra.mxu1 %vm36_vm0, %v82_v28  ;;  %v79_v30 = vadd.f32 1.0, %v246_v29 }
  0xa2   :  { %v81_v31 = vmul.f32 0.5, %v79_v30 }
  0xa4   :  { %v83_v32 = vmul.f32 %v81_v31, %v64_v17 }
  0xa6   :  { %227 = vmatmul.msk.f32.vlgmr.msra.gmra.mxu3 %vm36_vm0, %v83_v32 }
 0x11d   :  { %v115_v34 = vpop.f32.mrf.mxu1 }
 0x11e   :  { %v116_v36 = vadd.f32 %v242_v33, %v115_v34 }
 0x120   :  { %121 = vst [vmem:[%s389_s6] sm:$0xff] %v116_v36  ;;  %129 = vmax.xlane.f32.xlu0 %v116_v36  ;;  %v149_v37 = vmul.f32 %v123_v35, %v116_v36 }
 0x122   :  { %151 = vadd.xlane.f32.xlu2 %v149_v37 }
 0x129   :  { %v118_v38 = vpop.f32.mrf.mxu3 }
 0x12a   :  { %v119_v40 = vadd.f32 %v242_v33, %v118_v38 }
 0x12c   :  { %122 = vst [vmem:[%s389_s6 + $0x8] sm:$0xff] %v119_v40  ;;  %131 = vmax.xlane.f32.xlu0 %v119_v40  ;;  %v150_v41 = vmul.f32 %v124_v39, %v119_v40 }
 0x12e   :  { %153 = vadd.xlane.f32.xlu2 %v150_v41 }
 0x134   :  { %125 = vadd.xlane.f32.xlu0 %v123_v35 }
 0x193   :  { %v130_v42 = vpop.xlane.xlu0 %129 }
 0x194   :  { %v133_v43 = vsub.f32 %v116_v36, %v130_v42 }
 0x195   :  { %v152_v54 = vpop.xlane.xlu2 %151 }
 0x196   :  { %v135_v44 = vmul.f32 1.442695, %v133_v43 }
 0x198   :  { %247 = vpow2.f32 %v135_v44 }
 0x19e   :  { %v248_v45 = vpop.eup %247 }
 0x19f   :  { %139 = vadd.xlane.f32.xlu1 %v248_v45  ;;  %v132_v46 = vpop.xlane.xlu0 %131 }
 0x1a0   :  { %v134_v47 = vsub.f32 %v119_v40, %v132_v46 }
 0x1a1   :  { %v154_v1 = vpop.xlane.xlu2 %153 }
 0x1a2   :  { %v137_v48 = vmul.f32 1.442695, %v134_v47 }
 0x1a4   :  { %249 = vpow2.f32 %v137_v48 }
 0x1a7   :  { %v126_v56 = vpop.xlane.xlu0 %125 }
 0x1a8   :  { %v173_v58 = vsel %vm159_vm1, %v126_v56, 0.0 }
 0x1aa   :  { %v250_v49 = vpop.eup %249 }
 0x1ab   :  { %141 = vadd.xlane.f32.xlu1 %v250_v49 }
 0x1b3   :  { %127 = vadd.xlane.f32.xlu1 %v124_v39 }
 0x212   :  { %v140_v50 = vpop.xlane.xlu1 %139 }
 0x213   :  { %251 = vlog2.f32 %v140_v50 }
 0x219   :  { %v252_v51 = vpop.eup %251 }
 0x21a   :  { %v144_v52 = vmul.f32 0.6931472, %v252_v51 }
 0x21c   :  { %v147_v55 = vadd.f32 %v144_v52, %v130_v42 }
 0x21e   :  { %v142_v53 = vpop.xlane.xlu1 %141  ;;  %v155_v60 = vsub.f32 %v147_v55, %v152_v54 }
 0x21f   :  { %253 = vlog2.f32 %v142_v53 }
 0x220   :  { %v157_v2 = vmul.f32 %v155_v60, %v126_v56 }
 0x222   :  { %v160_v5 = vsel %vm159_vm1, %v157_v2, 0.0 }
 0x225   :  { %v254_v57 = vpop.eup %253 }
 0x226   :  { %v146_v59 = vmul.f32 0.6931472, %v254_v57  ;;  %v128_v61 = vpop.xlane.xlu1 %127 }
 0x227   :  { %v174_v62 = vsel %vm159_vm1, %v128_v61, 0.0 }
 0x228   :  { %v148_v63 = vadd.f32 %v146_v59, %v132_v46  ;;  %v175_v0 = vadd.f32 %v174_v62, %v173_v58 }
 0x22a   :  { %v156_v3 = vsub.f32 %v148_v63, %v154_v1  ;;  %176 = vadd.xlane.f32.xlu0 %v175_v0 }
 0x22c   :  { %v158_v4 = vmul.f32 %v156_v3, %v128_v61 }
 0x22e   :  { %v161_v6 = vsel %vm159_vm1, %v158_v4, 0.0 }
 0x22f   :  { %v162_v7 = vadd.f32 %v161_v6, %v160_v5 }
 0x231   :  { %163 = vadd.xlane.f32.xlu2 %v162_v7 }
 0x29d   :  { %v177_v8 = vpop.xlane.xlu0 %176 }
 0x29e   :  { %v178_v9 = vrot.slane %v177_v8, 4 }
 0x2a0   :  { %v179_v10 = vadd.f32 %v178_v9, %v177_v8 }
 0x2a2   :  { %v180_v11 = vrot.slane %v179_v10, 2 }
 0x2a4   :  { %v164_v12 = vpop.xlane.xlu2 %163  ;;  %v181_v15 = vadd.f32 %v180_v11, %v179_v10 }
 0x2a5   :  { %v165_v13 = vrot.slane %v164_v12, 4 }
 0x2a6   :  { %v182_v18 = vrot.slane %v181_v15, 1 }
 0x2a7   :  { %v166_v14 = vadd.f32 %v165_v13, %v164_v12 }
 0x2a8   :  { %v183_v21 = vadd.f32 %v182_v18, %v181_v15 }
 0x2a9   :  { %v167_v16 = vrot.slane %v166_v14, 2 }
 0x2ab   :  { %v168_v17 = vadd.f32 %v167_v16, %v166_v14 }
 0x2ad   :  { %v169_v19 = vrot.slane %v168_v17, 1 }
 0x2af   :  { %v170_v20 = vadd.f32 %v169_v19, %v168_v17 }
 0x2b1   :  { %236 = vpush %v170_v20 }
 0x2b2   :  { %238 = vpush %v183_v21 }
 0x2e2   :  { %s237_s5 = spop %236 }
 0x2e3   :  { %s239_s6 = spop %238  ;;  %v172_v33 = vstv %s237_s5 }
 0x2e4   :  { %v185_v22 = vstv %s239_s6 }
 0x2e5   :  { %v186_v23 = vmax.f32 %v185_v22, 1.0 }
 0x2e7   :  { %255 = vrcp.f32 %v186_v23  ;;  %v198_v27 = vand.u32 2147483648, %v186_v23  ;;  %v196_v29 = vand.u32 2147483647, %v186_v23  ;;  %vm192_vm3 = vweird.f32 %v186_v23 }
 0x2e9   :  { %v199_v31 = vor.u32 1.1754944e-38, %v198_v27  ;;  %vm197_vm5 = vcmp.eq.f32.partialorder %v196_v29, 8.507059e+37 }
 0x2ed   :  { %v256_v24 = vpop.eup %255 }
 0x2ee   :  { %v188_v25 = vmul.f32 %v256_v24, %v186_v23  ;;  %vm193_vm2 = vweird.f32 %v256_v24 }
 0x2ef   :  { %vm194_vm4 = vmor %vm192_vm3, %vm193_vm2 }
 0x2f0   :  { %v189_v26 = vsub.f32 1.0, %v188_v25 }
 0x2f2   :  { %v190_v28 = vmul.f32 %v256_v24, %v189_v26 }
 0x2f4   :  { %v191_v30 = vadd.f32 %v256_v24, %v190_v28 }
 0x2f6   :  { %v195_v32 = vsel %vm194_vm4, %v256_v24, %v191_v30 }
 0x2f7   :  { %v200_v34 = vsel %vm197_vm5, %v199_v31, %v195_v32 }
 0x2f8   :  { %v201_v35 = vmul.f32 %v200_v34, %v172_v33 }
 0x2fa   :  { %203 = vst.msk [vmem:[#allocation2] sm:$0x1] %vm202_vm6, %v201_v35 }
 0x2fb   :  { %216 = dma.vmem_to_hbm [thread:$0]  %s212_s29, 16, %s214_s9, [#allocation3]  }
 0x2fc   :  { %281 = dma.done.wait [#allocation3], 16  }
 0x2fd   :  { %282 = vsyncadd [#allocation3], 4294967280 }
 0x2fe   :  { %223 = vsyncpa [#allocation3], 1 }

</bundles_post_ra>
